<compile_context>
chip_gen: v6e
topology: v6e:2x2x1
jax: 0.10.0
libtpu: 0.0.40
codegen_flags: <defaults>
</compile_context>

<pallas_src>
import functools
import math

import jax
import jax.numpy as jnp
from jax.experimental import pallas as pl
from jax.experimental.pallas import tpu as pltpu


# ---------------------------------------------------------------------------
# Helpers
# ---------------------------------------------------------------------------
def _pick_tile(dim, candidates):
    """Largest candidate that strictly divides `dim`, else the full dim."""
    for c in candidates:
        if dim > c and dim % c == 0:
            return c
    return dim


# ---------------------------------------------------------------------------
# Kernel 1: bias-free linear projection  y = x @ W^T  (PyTorch nn.Linear layout)
#   Tiled over (M, N, K); f32 accumulator in VMEM; W is contracted along its
#   last axis via dot_general so no transpose is ever materialized.
# ---------------------------------------------------------------------------
def _linear_kernel(x_ref, w_ref, o_ref, acc_ref):
    @pl.when(pl.program_id(2) == 0)
    def _():
        acc_ref[...] = jnp.zeros_like(acc_ref)

    acc_ref[...] += jax.lax.dot_general(
        x_ref[...], w_ref[...],
        dimension_numbers=(((1,), (1,)), ((), ())),   # contract x dim1 with w dim1
        preferred_element_type=jnp.float32,
    )

    @pl.when(pl.program_id(2) == pl.num_programs(2) - 1)
    def _():
        o_ref[...] = acc_ref[...].astype(o_ref.dtype)


def linear_nobias(x2d, w):
    """x2d: [M, D_in], w: [D_out, D_in] (PyTorch layout). Returns [M, D_out]."""
    M, K = x2d.shape
    N = w.shape[0]
    tm = _pick_tile(M, (512, 256, 128))
    tn = _pick_tile(N, (512, 256, 128))
    tk = _pick_tile(K, (512, 256, 128))
    grid = (M // tm, N // tn, K // tk)
    return pl.pallas_call(
        _linear_kernel,
        out_shape=jax.ShapeDtypeStruct((M, N), x2d.dtype),
        grid_spec=pltpu.PrefetchScalarGridSpec(
            num_scalar_prefetch=0,
            grid=grid,
            in_specs=[
                pl.BlockSpec((tm, tk), lambda i, j, k: (i, k)),
                pl.BlockSpec((tn, tk), lambda i, j, k: (j, k)),
            ],
            out_specs=pl.BlockSpec((tm, tn), lambda i, j, k: (i, j)),
            scratch_shapes=[pltpu.VMEM((tm, tn), jnp.float32)],
        ),
        compiler_params=pltpu.CompilerParams(
            dimension_semantics=("parallel", "parallel", "arbitrary"),
            vmem_limit_bytes=48 * 1024 * 1024,
        ),
    )(x2d, w)


# ---------------------------------------------------------------------------
# Kernel 2: multi-head scaled dot-product attention.
#   Blocks index head groups along the packed feature axis of [B, S, D], so no
#   head transposes are needed; mask is broadcast in VMEM from [1/S_q, S_k].
# ---------------------------------------------------------------------------
def _mha_kernel(q_ref, k_ref, v_ref, m_ref, o_ref, p_ref, *, hsub, d_k, scale):
    # q_ref: [1, tq, hsub*d_k]   k_ref/v_ref: [1, Sk, hsub*d_k]
    # m_ref: [1, mq, Sk] (mq in {1, tq})
    # o_ref: [1, tq, hsub*d_k]   p_ref: [1, hsub, tq, Sk]
    masked = m_ref[0, :, :] == 0.0                      # broadcast over query rows
    for j in range(hsub):                               # unrolled; one matmul pair per head
        lo = j * d_k
        qj = q_ref[0, :, lo:lo + d_k] * scale           # fold 1/sqrt(d_k) into q
        kj = k_ref[0, :, lo:lo + d_k]
        vj = v_ref[0, :, lo:lo + d_k]

        s = jax.lax.dot_general(                        # [tq, Sk]
            qj, kj, (((1,), (1,)), ((), ())),
            preferred_element_type=jnp.float32,
        )
        s = jnp.where(masked, jnp.float32(-1e9), s)

        # numerically stable softmax; divide via EUP reciprocal + one Newton step
        s = s - jnp.max(s, axis=-1, keepdims=True)
        e = jnp.exp(s)
        den = jnp.sum(e, axis=-1, keepdims=True)
        inv = pl.reciprocal(den, approx=True)
        inv = inv * (2.0 - den * inv)
        p = e * inv

        # TODO(synk): training-mode dropout on attention probs not applied
        # (module reproduced in eval mode / p=0; use pltpu.prng_* for training).
        p_ref[0, j, :, :] = p.astype(p_ref.dtype)
        o = jnp.dot(p.astype(vj.dtype), vj, preferred_element_type=jnp.float32)
        o_ref[0, :, lo:lo + d_k] = o.astype(o_ref.dtype)


def attention_heads(qp, kp, vp, mask_c, h, *, probs_dtype=jnp.float32):
    """qp: [B, Sq, D], kp/vp: [B, Sk, D], mask_c: [B, {1,Sq}, Sk] float32.
    Returns (attention output [B, Sq, D], probs [B, h, Sq, Sk])."""
    B, Sq, D = qp.shape
    Sk = kp.shape[1]
    d_k = D // h
    mq = mask_c.shape[1]

    # Smallest head group whose packed width is lane-dense (mult of 128);
    # otherwise take all heads (full feature dim is always a legal block).
    hsub = h
    for cand in range(1, h + 1):
        if h % cand == 0 and (cand * d_k) % 128 == 0:
            hsub = cand
            break
    hd = hsub * d_k

    tq = _pick_tile(Sq, (256, 128))       # bound the per-step score tile
    grid = (B, h // hsub, Sq // tq)
    scale = 1.0 / math.sqrt(d_k)
    kernel = functools.partial(_mha_kernel, hsub=hsub, d_k=d_k, scale=scale)

    if mq == Sq:
        mqb = tq
        mask_map = lambda b, g, qi: (b, qi, 0)
    else:
        mqb = 1
        mask_map = lambda b, g, qi: (b, 0, 0)

    return pl.pallas_call(
        kernel,
        out_shape=(
            jax.ShapeDtypeStruct((B, Sq, D), qp.dtype),
            jax.ShapeDtypeStruct((B, h, Sq, Sk), probs_dtype),
        ),
        grid_spec=pltpu.PrefetchScalarGridSpec(
            num_scalar_prefetch=0,
            grid=grid,
            in_specs=[
                pl.BlockSpec((1, tq, hd), lambda b, g, qi: (b, qi, g)),
                pl.BlockSpec((1, Sk, hd), lambda b, g, qi: (b, 0, g)),
                pl.BlockSpec((1, Sk, hd), lambda b, g, qi: (b, 0, g)),
                pl.BlockSpec((1, mqb, Sk), mask_map),
            ],
            out_specs=[
                pl.BlockSpec((1, tq, hd), lambda b, g, qi: (b, qi, g)),
                pl.BlockSpec((1, hsub, tq, Sk), lambda b, g, qi: (b, g, qi, 0)),
            ],
        ),
        compiler_params=pltpu.CompilerParams(
            dimension_semantics=("parallel", "parallel", "parallel"),
            vmem_limit_bytes=48 * 1024 * 1024,
        ),
    )(qp, kp, vp, mask_c)


# ---------------------------------------------------------------------------
# Full MultiHeadAttentionBlock forward
# ---------------------------------------------------------------------------
def _canonicalize_mask(mask, B, Sq, Sk):
    """Return float32 mask of shape [B, Mq, Sk] with Mq in {1, Sq} (0 == masked)."""
    if mask is None:
        return jnp.ones((B, 1, Sk), jnp.float32)
    m = jnp.asarray(mask)
    if m.ndim == 4:
        # TODO(synk): per-head masks ([B, H, Sq, Sk]) collapse to head 0 here.
        m = m[:, 0]
    if m.ndim == 2:
        m = m[:, None, :]
    m = m.astype(jnp.float32)
    mq = m.shape[1] if m.shape[1] in (1, Sq) else Sq
    return jnp.broadcast_to(m, (B, mq, Sk))


def multi_head_attention_block(q, k, v, mask, params, h, *, probs_dtype=jnp.float32):
    """q: [B, Sq, d_model], k/v: [B, Sk, d_model]; mask None / [B,Sk] / [B,Sq,Sk] / [B,1,*,Sk].
    Returns (w_o(attention(...)), attention probabilities [B, h, Sq, Sk])."""
    B, Sq, D = q.shape
    Sk = k.shape[1]
    assert D % h == 0

    if q is k and k is v:
        # Self-attention: read the activations from HBM once for all three projections.
        w_qkv = jnp.concatenate([params["w_q"], params["w_k"], params["w_v"]], axis=0)
        y = linear_nobias(q.reshape(B * Sq, D), w_qkv)          # [B*Sq, 3D]
        qp = y[:, :D].reshape(B, Sq, D)
        kp = y[:, D:2 * D].reshape(B, Sk, D)
        vp = y[:, 2 * D:].reshape(B, Sk, D)
    else:
        qp = linear_nobias(q.reshape(B * Sq, D), params["w_q"]).reshape(B, Sq, D)
        kp = linear_nobias(k.reshape(B * Sk, D), params["w_k"]).reshape(B, Sk, D)
        vp = linear_nobias(v.reshape(B * Sk, D), params["w_v"]).reshape(B, Sk, D)

    mask_c = _canonicalize_mask(mask, B, Sq, Sk)
    x, probs = attention_heads(qp, kp, vp, mask_c, h, probs_dtype=probs_dtype)

    out = linear_nobias(x.reshape(B * Sq, D), params["w_o"]).reshape(B, Sq, D)
    return out, probs


def init_params(key, d_model):
    """Deterministic bias-free Linear weights, PyTorch layout [out, in]."""
    ks = jax.random.split(key, 4)
    bound = 1.0 / math.sqrt(d_model)
    mk = lambda k: jax.random.uniform(k, (d_model, d_model), jnp.float32, -bound, bound)
    return {"w_q": mk(ks[0]), "w_k": mk(ks[1]), "w_v": mk(ks[2]), "w_o": mk(ks[3])}


def _reference(q, k, v, mask, params, h):
    """Pure-JAX reference matching the PyTorch module (eval mode)."""
    B, Sq, D = q.shape
    d_k = D // h
    proj = lambda x, w: jnp.einsum("bsd,ed->bse", x, w, precision="highest")
    qp = proj(q, params["w_q"]).reshape(B, Sq, h, d_k).transpose(0, 2, 1, 3)
    kp = proj(k, params["w_k"]).reshape(B, -1, h, d_k).transpose(0, 2, 1, 3)
    vp = proj(v, params["w_v"]).reshape(B, -1, h, d_k).transpose(0, 2, 1, 3)
    s = jnp.einsum("bhqd,bhkd->bhqk", qp, kp, precision="highest") / math.sqrt(d_k)
    s = jnp.where(mask[:, None, None, :] == 0, -1e9, s)
    p = jax.nn.softmax(s, axis=-1)
    o = jnp.einsum("bhqk,bhkd->bhqd", p, vp, precision="highest")
    o = o.transpose(0, 2, 1, 3).reshape(B, Sq, D)
    return proj(o, params["w_o"]), p


if __name__ == "__main__":
    B, S, d_model, h = 2, 8, 32, 4  # d_k = 8
    key = jax.random.PRNGKey(0)
    kq, kk, kv, kp = jax.random.split(key, 4)

    q = jax.random.normal(kq, (B, S, d_model), jnp.float32)
    k = jax.random.normal(kk, (B, S, d_model), jnp.float32)
    v = jax.random.normal(kv, (B, S, d_model), jnp.float32)

    # Key-padding mask: first sequence keeps 6 tokens, second keeps all 8
    lengths = jnp.array([6, 8], dtype=jnp.int32)
    mask = (jnp.arange(S)[None, :] < lengths[:, None]).astype(jnp.float32)  # [B, S]

    params = init_params(kp, d_model)

    # Cross-attention style call (q, k, v distinct) — separate projections.
    out, attn = multi_head_attention_block(q, k, v, mask, params, h)
    jax.block_until_ready((out, attn))
    assert out.shape == (B, S, d_model)
    assert attn.shape == (B, h, S, S)

    out_ref, attn_ref = _reference(q, k, v, mask, params, h)
    assert jnp.allclose(out, out_ref, atol=2e-2, rtol=2e-2)
    assert jnp.allclose(attn, attn_ref, atol=2e-2, rtol=2e-2)

    # Self-attention call (q is k is v) — exercises the fused QKV projection path.
    out2, attn2 = multi_head_attention_block(q, q, q, mask, params, h)
    jax.block_until_ready((out2, attn2))
    assert out2.shape == (B, S, d_model)
    assert attn2.shape == (B, h, S, S)
    assert bool(jnp.all(jnp.isfinite(out2)))

    print("KERNEL_OK")
</pallas_src>

<mosaic_0001>
module attributes {stable_mosaic.version = 11 : i64} {
  func.func @_linear_kernel(%arg0: i32, %arg1: i32, %arg2: i32, %arg3: memref<16x32xf32, #tpu.memory_space<vmem>>, %arg4: memref<32x32xf32, #tpu.memory_space<vmem>>, %arg5: memref<16x32xf32, #tpu.memory_space<vmem>>, %arg6: memref<16x32xf32, #tpu.memory_space<vmem>>) attributes {dimension_semantics = [#tpu.dimension_semantics<parallel>, #tpu.dimension_semantics<parallel>, #tpu.dimension_semantics<arbitrary>], iteration_bounds = array<i64: 1, 1, 1>, scalar_prefetch = 0 : i64, scratch_operands = 1 : i64, tpu.core_type = #tpu.core_type<tc>, window_params = [{transform_indices = @transform_0, window_bounds = array<i64: 16, 32>}, {transform_indices = @transform_1, window_bounds = array<i64: 32, 32>}, {transform_indices = @transform_2, window_bounds = array<i64: 16, 32>}]} {
    %c0_i32 = arith.constant 0 : i32
    %0 = arith.cmpi eq, %arg2, %c0_i32 : i32
    %1 = arith.extui %0 : i1 to i32
    %c0_i32_0 = arith.constant 0 : i32
    %2 = arith.cmpi ne, %1, %c0_i32_0 : i32
    scf.if %2 {
      %cst_10 = arith.constant 0.000000e+00 : f32
      %12 = vector.broadcast %cst_10 : f32 to vector<16x32xf32>
      %c0_11 = arith.constant 0 : index
      %c0_12 = arith.constant 0 : index
      %13 = vector.load %arg6[%c0_11, %c0_12] : memref<16x32xf32, #tpu.memory_space<vmem>>, vector<16x32xf32>
      tpu.vector_store %arg6[%c0_11, %c0_12], %12 {strides = array<i32>} : memref<16x32xf32, #tpu.memory_space<vmem>>, vector<16x32xf32>,
    } else {
    }
    %c0 = arith.constant 0 : index
    %c0_1 = arith.constant 0 : index
    %3 = vector.load %arg6[%c0, %c0_1] : memref<16x32xf32, #tpu.memory_space<vmem>>, vector<16x32xf32>
    %c0_2 = arith.constant 0 : index
    %c0_3 = arith.constant 0 : index
    %4 = vector.load %arg3[%c0_2, %c0_3] : memref<16x32xf32, #tpu.memory_space<vmem>>, vector<16x32xf32>
    %c0_4 = arith.constant 0 : index
    %c0_5 = arith.constant 0 : index
    %5 = vector.load %arg4[%c0_4, %c0_5] : memref<32x32xf32, #tpu.memory_space<vmem>>, vector<32x32xf32>
    %cst = arith.constant dense<0.000000e+00> : vector<16x32xf32>
    %6 = tpu.matmul %4, %5, %cst {dimension_numbers = #tpu.dot_dimension_numbers<[1], [1], [0], [0], [0, 0, 1, 0], [], []>} : vector<16x32xf32>, vector<32x32xf32>, vector<16x32xf32> -> vector<16x32xf32>
    %7 = arith.addf %3, %6 : vector<16x32xf32>
    %c0_6 = arith.constant 0 : index
    %c0_7 = arith.constant 0 : index
    %8 = vector.load %arg6[%c0_6, %c0_7] : memref<16x32xf32, #tpu.memory_space<vmem>>, vector<16x32xf32>
    tpu.vector_store %arg6[%c0_6, %c0_7], %7 {strides = array<i32>} : memref<16x32xf32, #tpu.memory_space<vmem>>, vector<16x32xf32>,
    %c0_i32_8 = arith.constant 0 : i32
    %9 = arith.cmpi eq, %arg2, %c0_i32_8 : i32
    %10 = arith.extui %9 : i1 to i32
    %c0_i32_9 = arith.constant 0 : i32
    %11 = arith.cmpi ne, %10, %c0_i32_9 : i32
    scf.if %11 {
      %c0_10 = arith.constant 0 : index
      %c0_11 = arith.constant 0 : index
      %12 = vector.load %arg6[%c0_10, %c0_11] : memref<16x32xf32, #tpu.memory_space<vmem>>, vector<16x32xf32>
      %c0_12 = arith.constant 0 : index
      %c0_13 = arith.constant 0 : index
      %13 = vector.load %arg5[%c0_12, %c0_13] : memref<16x32xf32, #tpu.memory_space<vmem>>, vector<16x32xf32>
      tpu.vector_store %arg5[%c0_12, %c0_13], %12 {strides = array<i32>} : memref<16x32xf32, #tpu.memory_space<vmem>>, vector<16x32xf32>,
    } else {
    }
    return
  }
  func.func @transform_0(%arg0: i32, %arg1: i32, %arg2: i32) -> (i32, i32) {
    %c0_i32 = arith.constant 0 : i32
    return %arg0, %arg2 : i32, i32
  }
  func.func @transform_1(%arg0: i32, %arg1: i32, %arg2: i32) -> (i32, i32) {
    %c0_i32 = arith.constant 0 : i32
    return %arg1, %arg2 : i32, i32
  }
  func.func @transform_2(%arg0: i32, %arg1: i32, %arg2: i32) -> (i32, i32) {
    %c0_i32 = arith.constant 0 : i32
    return %arg0, %arg1 : i32, i32
  }
}

</mosaic_0001>

<bundles_post_ra>
// kernel: tpu_custom_call.1
= control target key start
LH: loop header
LB: loop body
LE: loop exit
PB: predicated region body
PF: predicated region fallthrough
CT: control target
= control target key end

     0   :  { %7 = vsyncpa [#allocation4], 0  ;;  %s328_s0 = inlined_call_operand.hbm [shape: f32[16,32], index: 0, kind: input, shape index: {}]   ;;  %s329_s1 = inlined_call_operand.hbm [shape: f32[32,32], index: 1, kind: input, shape index: {}]   ;;  %s330_s2 = inlined_call_operand.hbm [shape: f32[16,32], index: 2, kind: output, shape index: {}]  }
   0x1   :  { %8 = vsyncpa [#allocation7], 0 }
   0x2   :  { %9 = vsyncpa [#allocation5], 0  ;;  %s273_s9 = smov [#allocation3]  }
   0x3   :  { %s15_s10 = sshll.u32 %s273_s9, 4  ;;  %s16_s10 = int_to_ptr.vmem [resolvable:$true] %s15_s10 }
   0x4   :  { %s215_s11 = scalar_lea.vmem %s16_s10, 256  ;;  %p220_p1 = scmp.lt.s32.totalorder %s16_s10, %s16_s10 }
   0x5   :  { %p216_p0 = scmp.ne.s32.totalorder %s16_s10, %s215_s11  ;;  %p221_p2 = scmp.lt.s32.totalorder %s215_s11, %s215_s11 }
   0x7   :  { %p222_p3 = por %p221_p2, %p220_p1 }
   0x9   :  { %p223_p4 = pnand %p222_p3, %p216_p0 }
   0xb   :  { %226 = shalt.err (!%p223_p4)
}
   0xc   :  { %s274_s12 = smov 128   ;;  %s275_s13 = smov 8  }
   0xd   :  { %21 = dma.hbm_to_vmem [thread:$0]  %s328_s0, 256, %s16_s10, [#allocation4], %s274_s12, %s274_s12, %s275_s13  }
   0xe   :  { %s276_s16 = smov [#allocation6]  }
   0xf   :  { %s27_s17 = sshll.u32 %s276_s16, 4  ;;  %s28_s17 = int_to_ptr.vmem [resolvable:$true] %s27_s17 }
  0x10   :  { %s235_s18 = scalar_lea.vmem %s28_s17, 512  ;;  %p240_p6 = scmp.lt.s32.totalorder %s28_s17, %s28_s17 }
  0x11   :  { %p236_p5 = scmp.ne.s32.totalorder %s28_s17, %s235_s18  ;;  %p241_p7 = scmp.lt.s32.totalorder %s235_s18, %s235_s18 }
  0x13   :  { %p242_p8 = por %p241_p7, %p240_p6 }
  0x15   :  { %p243_p9 = pnand %p242_p8, %p236_p5 }
  0x17   :  { %246 = shalt.err (!%p243_p9)
}
  0x18   :  { %33 = dma.hbm_to_vmem [thread:$0]  %s329_s1, 512, %s28_s17, [#allocation7], %s274_s12, %s274_s12, %s275_s13  }
  0x19   :  { %267 = dma.done.wait [#allocation4], 256  }
  0x1a   :  { %268 = vsyncadd [#allocation4], 4294967040 }
  0x1b   :  { %269 = dma.done.wait [#allocation7], 512  }
  0x1c   :  { %270 = vsyncadd [#allocation7], 4294966784  ;;  %vm44_vm0 = vcmask 261120   ;;  %v277_v0 = vmov 0.0   ;;  %v54_v1 = vld [vmem:[#allocation6 + $0x18] sm:$0xff]  ;;  %v53_v2 = vld [vmem:[#allocation6 + $0x10] sm:$0xff] }
  0x1d   :  { %46 = vst.msk [vmem:[#allocation2 + $0x8] sm:$0xff] %vm44_vm0, %v277_v0  ;;  %45 = vst.msk [vmem:[#allocation2] sm:$0xff] %vm44_vm0, %v277_v0  ;;  %190 = vmatprep.subr.msk.mxu0 %vm44_vm0, %v54_v1  ;;  %v49_v3 = vld [vmem:[#allocation3] sm:$0xff]  ;;  %v52_v4 = vld [vmem:[#allocation6 + $0x8] sm:$0xff]  ;;  %s278_s0 = smov [#allocation8]  }
  0x1e   :  { %191 = vmatpush3.xpose.msk.msra.mxu0 %vm44_vm0, %v54_v1  ;;  %198 = vmatprep.mubr.msk.f32.mxu0 %vm44_vm0, %v49_v3  ;;  %v51_v5 = vld [vmem:[#allocation6] sm:$0xff]  ;;  %v50_v6 = vld [vmem:[#allocation3 + $0x8] sm:$0xff]  ;;  %s165_s1 = sshll.u32 %s278_s0, 4  ;;  %s166_s1 = int_to_ptr.vmem [resolvable:$true] %s165_s1 }
  0x1f   :  { %192 = vmatprep.subr.msk.mxu0 %vm44_vm0, %v53_v2  ;;  %s247_s21 = scalar_lea.vmem %s166_s1, 256  ;;  %p252_p11 = scmp.lt.s32.totalorder %s166_s1, %s166_s1 }
  0x20   :  { %p248_p10 = scmp.ne.s32.totalorder %s166_s1, %s247_s21  ;;  %p253_p12 = scmp.lt.s32.totalorder %s247_s21, %s247_s21 }
  0x22   :  { %193 = vmatpush3.xpose.msk.msra.mxu0 %vm44_vm0, %v53_v2  ;;  %p254_p13 = por %p253_p12, %p252_p11 }
  0x23   :  { %194 = vmatprep.subr.msk.mxu0 %vm44_vm0, %v52_v4 }
  0x24   :  { %v48_v7 = vld [vmem:[#allocation2 + $0x8] sm:$0xff]  ;;  %v47_v9 = vld [vmem:[#allocation2] sm:$0xff]  ;;  %p255_p0 = pnand %p254_p13, %p248_p10 }
  0x26   :  { %195 = vmatpush3.xpose.msk.msra.mxu0 %vm44_vm0, %v52_v4 }
  0x27   :  { %196 = vmatprep.subr.msk.mxu0 %vm44_vm0, %v51_v5 }
  0x2a   :  { %197 = vmatpush3.xpose.msk.msra.mxu0 %vm44_vm0, %v51_v5 }
  0x2d   :  { %199 = vmatmul.mubr.msk.f32.vlgmr.msra.gmra.mxu0 %vm44_vm0, %v50_v6 }
  0xed   :  { %v200_v8 = vpop.f32.mrf.mxu0 }
  0xee   :  { %v150_v10 = vadd.f32 %v200_v8, %v48_v7 }
  0xef   :  { %v140_v11 = vpop.f32.mrf.mxu0 }
  0xf0   :  { %152 = vst.msk [vmem:[#allocation2 + $0x8] sm:$0xff] %vm44_vm0, %v150_v10  ;;  %v149_v12 = vadd.f32 %v140_v11, %v47_v9 }
  0xf2   :  { %151 = vst.msk [vmem:[#allocation2] sm:$0xff] %vm44_vm0, %v149_v12 }
  0xf7   :  { %v157_v13 = vld [vmem:[#allocation2 + $0x8] sm:$0xff] }
  0xf8   :  { %159 = vst.msk [vmem:[#allocation8 + $0x8] sm:$0xff] %vm44_vm0, %v157_v13 }
  0xf9   :  { %v156_v14 = vld [vmem:[#allocation2] sm:$0xff] }
  0xfa   :  { %158 = vst.msk [vmem:[#allocation8] sm:$0xff] %vm44_vm0, %v156_v14 }
  0xfb   :  { %258 = shalt.err (!%p255_p0)
}
  0xfc   :  { %171 = dma.vmem_to_hbm [thread:$0]  %s166_s1, 256, %s330_s2, [#allocation5], %s274_s12, %s274_s12, %s275_s13  }
  0xfd   :  { %271 = dma.done.wait [#allocation5], 256  }
  0xfe   :  { %272 = vsyncadd [#allocation5], 4294967040 }
  0xff   :  { %175 = vsyncpa [#allocation4], 1 }
 0x100   :  { %176 = vsyncpa [#allocation7], 1 }
 0x101   :  { %177 = vsyncpa [#allocation5], 1 }

</bundles_post_ra>
